<compile_context>
chip_gen: v5e
topology: v5e:2x2
jax: 0.10.0
libtpu: 0.0.40
codegen_flags: <defaults>
</compile_context>

<pallas_src>
import functools

import jax
import jax.numpy as jnp
from jax.experimental import pallas as pl
from jax.experimental.pallas import tpu as pltpu

_NEG_BIG = -1e30  # effectively -inf for the logsumexp masking


def _circle_loss_kernel(b_actual, params_ref, x_rows_ref, x_cols_ref,
                        tgt_row_ref, tgt_col_ref, out_ref, acc_ref):
    # params_ref:  SMEM (2,) f32  -> [m, gamma]
    # x_rows_ref:  VMEM (TB, D)   -> current row tile of x
    # x_cols_ref:  VMEM (Bp, D)   -> full (padded) x, resident across the grid
    # tgt_row_ref: VMEM (TB, 1)   -> labels for the row tile
    # tgt_col_ref: VMEM (1, Bp)   -> all labels
    # out_ref:     VMEM (1, 1)    -> scalar loss
    # acc_ref:     VMEM (TB, 1)   -> per-row loss accumulator
    i = pl.program_id(0)
    tb = x_rows_ref.shape[0]
    b_pad = x_cols_ref.shape[0]

    m = params_ref[0]
    gamma = params_ref[1]

    @pl.when(i == 0)
    def _():
        acc_ref[...] = jnp.zeros_like(acc_ref)

    x_rows = x_rows_ref[...].astype(jnp.float32)
    x_cols = x_cols_ref[...].astype(jnp.float32)

    # (TB, Bp) similarity tile on the MXU: x_rows @ x_cols.T
    sim = jax.lax.dot_general(
        x_rows, x_cols, (((1,), (1,)), ((), ())),
        preferred_element_type=jnp.float32)

    # Global row / column indices for the strict upper triangle + padding masks.
    row_idx = jax.lax.broadcasted_iota(jnp.int32, (tb, b_pad), 0) + i * tb
    col_idx = jax.lax.broadcasted_iota(jnp.int32, (tb, b_pad), 1)

    label = tgt_row_ref[...] == tgt_col_ref[...]     # (TB,1)==(1,Bp) -> (TB,Bp)
    upper = col_idx > row_idx                        # triu(., 1)

    pos = jnp.logical_and(label, upper)
    neg = jnp.logical_and(jnp.logical_not(label), upper)

    sp = jnp.where(pos, sim, 0.0)
    sn = jnp.where(neg, sim, 0.0)

    ap = jnp.maximum(1.0 + m - sp, 0.0)
    an = jnp.maximum(sn + m, 0.0)
    dp = 1.0 - m
    dn = m
    logit_p = -gamma * ap * (sp - dp)
    logit_n = gamma * an * (sn - dn)

    if b_actual != b_pad:
        # Padded columns must not contribute to the row logsumexp.
        col_valid = col_idx < b_actual
        logit_p = jnp.where(col_valid, logit_p, _NEG_BIG)
        logit_n = jnp.where(col_valid, logit_n, _NEG_BIG)

    # Row-wise numerically stable logsumexp (axis=1).
    max_p = jnp.max(logit_p, axis=1, keepdims=True)
    max_n = jnp.max(logit_n, axis=1, keepdims=True)
    lse_p = jnp.log(jnp.sum(jnp.exp(logit_p - max_p), axis=1, keepdims=True)) + max_p
    lse_n = jnp.log(jnp.sum(jnp.exp(logit_n - max_n), axis=1, keepdims=True)) + max_n

    z = lse_p + lse_n                                # (TB, 1)
    # Stable softplus: max(z, 0) + log(1 + exp(-|z|))
    row_loss = jnp.maximum(z, 0.0) + jnp.log(1.0 + jnp.exp(-jnp.abs(z)))

    if b_actual != b_pad:
        # Padded rows must not contribute to the mean.
        local_row = jax.lax.broadcasted_iota(jnp.int32, (tb, 1), 0) + i * tb
        row_loss = jnp.where(local_row < b_actual, row_loss, 0.0)

    acc_ref[...] += row_loss

    @pl.when(i == pl.num_programs(0) - 1)
    def _():
        total = jnp.sum(acc_ref[...])                # single cross-sublane reduce
        out_ref[...] = jnp.reshape(total * (1.0 / b_actual), (1, 1))


def circle_loss(x, target, m, gamma, *, block_rows=512):
    """Pallas implementation of CircleLoss.forward. Returns a scalar f32."""
    b, d = x.shape

    # Row tile: multiple of 8 sublanes, capped at block_rows.
    b8 = ((b + 7) // 8) * 8
    tb = min(((block_rows + 7) // 8) * 8, b8)
    b_pad = ((b8 + tb - 1) // tb) * tb

    if b_pad != b:
        x = jnp.pad(x, ((0, b_pad - b), (0, 0)))
        target = jnp.pad(target, (0, b_pad - b), constant_values=-1)

    target = target.astype(jnp.int32)
    tgt_row = target.reshape(b_pad, 1)
    tgt_col = target.reshape(1, b_pad)
    params = jnp.array([m, gamma], dtype=jnp.float32)  # runtime scalars in SMEM

    kernel = functools.partial(_circle_loss_kernel, b)

    out = pl.pallas_call(
        kernel,
        out_shape=jax.ShapeDtypeStruct((1, 1), jnp.float32),
        grid_spec=pltpu.PrefetchScalarGridSpec(
            num_scalar_prefetch=0,
            grid=(b_pad // tb,),
            in_specs=[
                # [m, gamma] -> SMEM, no recompile when they change.
                pl.BlockSpec(memory_space=pltpu.MemorySpace.SMEM),
                # Row tile of x.
                pl.BlockSpec((tb, d), lambda i: (i, 0)),
                # Full x, resident in VMEM, used as the "columns" operand.
                pl.BlockSpec((b_pad, d), lambda i: (0, 0)),
                # Labels for the row tile / all columns.
                pl.BlockSpec((tb, 1), lambda i: (i, 0)),
                pl.BlockSpec((1, b_pad), lambda i: (0, 0)),
            ],
            # Single resident output block (accumulator pattern).
            out_specs=pl.BlockSpec((1, 1), lambda i: (0, 0)),
            scratch_shapes=[pltpu.VMEM((tb, 1), jnp.float32)],
        ),
        compiler_params=pltpu.CompilerParams(
            dimension_semantics=("arbitrary",)),  # reduction over row tiles
    )(params, x, x, tgt_row, tgt_col)
    return out[0, 0]


if __name__ == "__main__":
    batch, dim, classes = 12, 32, 4   # batch not a multiple of 8 -> exercises padding
    m, gamma = 0.25, 64.0

    key = jax.random.PRNGKey(0)
    k_x, k_t = jax.random.split(key)
    x = jax.random.normal(k_x, (batch, dim), dtype=jnp.float32)
    x = x / jnp.linalg.norm(x, axis=-1, keepdims=True)   # cosine embeddings
    target = jax.random.randint(k_t, (batch,), 0, classes, dtype=jnp.int32)

    loss = circle_loss(x, target, m, gamma)
    loss = jax.block_until_ready(loss)

    # Pure-JAX reference replicating the PyTorch forward exactly.
    sim = x @ x.T
    label = target[:, None] == target[None, :]
    iu = jnp.triu(jnp.ones((batch, batch), dtype=bool), k=1)
    sp = jnp.where(label & iu, sim, 0.0)
    sn = jnp.where(jnp.logical_not(label) & iu, sim, 0.0)
    ap = jnp.maximum(1.0 + m - sp, 0.0)
    an = jnp.maximum(sn + m, 0.0)
    logit_p = -gamma * ap * (sp - (1.0 - m))
    logit_n = gamma * an * (sn - m)
    ref = jnp.mean(jax.nn.softplus(
        jax.scipy.special.logsumexp(logit_p, axis=1)
        + jax.scipy.special.logsumexp(logit_n, axis=1)))

    assert jnp.allclose(loss, ref, rtol=1e-4, atol=1e-5), (loss, ref)
    print("KERNEL_OK")
</pallas_src>

<mosaic_0001>
module attributes {stable_mosaic.version = 11 : i64} {
  func.func @_circle_loss_kernel(%arg0: i32, %arg1: memref<2xf32, #tpu.memory_space<smem>>, %arg2: memref<16x32xf32, #tpu.memory_space<vmem>>, %arg3: memref<16x32xf32, #tpu.memory_space<vmem>>, %arg4: memref<16x1xi32, #tpu.memory_space<vmem>>, %arg5: memref<1x16xi32, #tpu.memory_space<vmem>>, %arg6: memref<1x1xf32, #tpu.memory_space<vmem>>, %arg7: memref<16x1xf32, #tpu.memory_space<vmem>>) attributes {dimension_semantics = [#tpu.dimension_semantics<arbitrary>], iteration_bounds = array<i64: 1>, scalar_prefetch = 0 : i64, scratch_operands = 1 : i64, tpu.core_type = #tpu.core_type<tc>, window_params = [{transform_indices = @transform_0, window_bounds = array<i64: 2>}, {transform_indices = @transform_1, window_bounds = array<i64: 16, 32>}, {pipeline_mode = #tpu.pipeline_mode<synchronous>, transform_indices = @transform_2, window_bounds = array<i64: 16, 32>}, {transform_indices = @transform_3, window_bounds = array<i64: 16, 1>}, {pipeline_mode = #tpu.pipeline_mode<synchronous>, transform_indices = @transform_4, window_bounds = array<i64: 1, 16>}, {pipeline_mode = #tpu.pipeline_mode<synchronous>, transform_indices = @transform_5, window_bounds = array<i64: 1, 1>}]} {
    %c0 = arith.constant 0 : index
    %0 = memref.load %arg1[%c0] : memref<2xf32, #tpu.memory_space<smem>>
    %c1 = arith.constant 1 : index
    %1 = memref.load %arg1[%c1] : memref<2xf32, #tpu.memory_space<smem>>
    %c0_i32 = arith.constant 0 : i32
    %2 = arith.cmpi eq, %arg0, %c0_i32 : i32
    %3 = arith.extui %2 : i1 to i32
    %c0_i32_0 = arith.constant 0 : i32
    %4 = arith.cmpi ne, %3, %c0_i32_0 : i32
    scf.if %4 {
      %cst_35 = arith.constant 0.000000e+00 : f32
      %96 = vector.broadcast %cst_35 : f32 to vector<16x1xf32>
      %c0_36 = arith.constant 0 : index
      %c0_37 = arith.constant 0 : index
      %97 = vector.load %arg7[%c0_36, %c0_37] : memref<16x1xf32, #tpu.memory_space<vmem>>, vector<16x1xf32>
      tpu.vector_store %arg7[%c0_36, %c0_37], %96 {strides = array<i32>} : memref<16x1xf32, #tpu.memory_space<vmem>>, vector<16x1xf32>,
    } else {
    }
    %c0_1 = arith.constant 0 : index
    %c0_2 = arith.constant 0 : index
    %5 = vector.load %arg2[%c0_1, %c0_2] : memref<16x32xf32, #tpu.memory_space<vmem>>, vector<16x32xf32>
    %c0_3 = arith.constant 0 : index
    %c0_4 = arith.constant 0 : index
    %6 = vector.load %arg3[%c0_3, %c0_4] : memref<16x32xf32, #tpu.memory_space<vmem>>, vector<16x32xf32>
    %cst = arith.constant dense<0.000000e+00> : vector<16x16xf32>
    %7 = tpu.matmul %5, %6, %cst {dimension_numbers = #tpu.dot_dimension_numbers<[1], [1], [0], [0], [0, 0, 1, 0], [], []>} : vector<16x32xf32>, vector<16x32xf32>, vector<16x16xf32> -> vector<16x16xf32>
    %8 = tpu.iota {dimensions = array<i32: 0>} : vector<16x16xi32>
    %c16_i32 = arith.constant 16 : i32
    %9 = arith.muli %arg0, %c16_i32 : i32
    %10 = vector.broadcast %9 : i32 to vector<16x16xi32>
    %11 = arith.addi %8, %10 : vector<16x16xi32>
    %12 = tpu.iota {dimensions = array<i32: 1>} : vector<16x16xi32>
    %c0_5 = arith.constant 0 : index
    %c0_6 = arith.constant 0 : index
    %13 = vector.load %arg4[%c0_5, %c0_6] : memref<16x1xi32, #tpu.memory_space<vmem>>, vector<16x1xi32>
    %c0_7 = arith.constant 0 : index
    %c0_8 = arith.constant 0 : index
    %14 = vector.load %arg5[%c0_7, %c0_8] : memref<1x16xi32, #tpu.memory_space<vmem>>, vector<1x16xi32>
    %15 = vector.broadcast %13 : vector<16x1xi32> to vector<16x16xi32>
    %16 = vector.broadcast %14 : vector<1x16xi32> to vector<16x16xi32>
    %17 = arith.cmpi eq, %15, %16 : vector<16x16xi32>
    %18 = arith.cmpi sgt, %12, %11 : vector<16x16xi32>
    %19 = arith.andi %17, %18 : vector<16x16xi1>
    %cst_9 = arith.constant dense<true> : vector<16x16xi1>
    %20 = arith.xori %17, %cst_9 : vector<16x16xi1>
    %21 = arith.andi %20, %18 : vector<16x16xi1>
    %cst_10 = arith.constant 0.000000e+00 : f32
    %22 = vector.broadcast %cst_10 : f32 to vector<16x16xf32>
    %23 = arith.select %19, %7, %22 : vector<16x16xi1>, vector<16x16xf32>
    %cst_11 = arith.constant 0.000000e+00 : f32
    %24 = vector.broadcast %cst_11 : f32 to vector<16x16xf32>
    %25 = arith.select %21, %7, %24 : vector<16x16xi1>, vector<16x16xf32>
    %cst_12 = arith.constant 1.000000e+00 : f32
    %26 = arith.addf %cst_12, %0 : f32
    %27 = vector.broadcast %26 : f32 to vector<16x16xf32>
    %28 = arith.subf %27, %23 : vector<16x16xf32>
    %cst_13 = arith.constant 0.000000e+00 : f32
    %29 = vector.broadcast %cst_13 : f32 to vector<16x16xf32>
    %30 = arith.maximumf %28, %29 : vector<16x16xf32>
    %31 = vector.broadcast %0 : f32 to vector<16x16xf32>
    %32 = arith.addf %25, %31 : vector<16x16xf32>
    %cst_14 = arith.constant 0.000000e+00 : f32
    %33 = vector.broadcast %cst_14 : f32 to vector<16x16xf32>
    %34 = arith.maximumf %32, %33 : vector<16x16xf32>
    %cst_15 = arith.constant 1.000000e+00 : f32
    %35 = arith.subf %cst_15, %0 : f32
    %cst_16 = arith.constant 0.000000e+00 : f32
    %36 = arith.subf %cst_16, %1 : f32
    %37 = vector.broadcast %36 : f32 to vector<16x16xf32>
    %38 = arith.mulf %37, %30 : vector<16x16xf32>
    %39 = vector.broadcast %35 : f32 to vector<16x16xf32>
    %40 = arith.subf %23, %39 : vector<16x16xf32>
    %41 = arith.mulf %38, %40 : vector<16x16xf32>
    %42 = vector.broadcast %1 : f32 to vector<16x16xf32>
    %43 = arith.mulf %42, %34 : vector<16x16xf32>
    %44 = vector.broadcast %0 : f32 to vector<16x16xf32>
    %45 = arith.subf %25, %44 : vector<16x16xf32>
    %46 = arith.mulf %43, %45 : vector<16x16xf32>
    %c12_i32 = arith.constant 12 : i32
    %47 = vector.broadcast %c12_i32 : i32 to vector<16x16xi32>
    %48 = arith.cmpi slt, %12, %47 : vector<16x16xi32>
    %cst_17 = arith.constant -1.000000e+30 : f32
    %49 = vector.broadcast %cst_17 : f32 to vector<16x16xf32>
    %50 = arith.select %48, %41, %49 : vector<16x16xi1>, vector<16x16xf32>
    %cst_18 = arith.constant -1.000000e+30 : f32
    %51 = vector.broadcast %cst_18 : f32 to vector<16x16xf32>
    %52 = arith.select %48, %46, %51 : vector<16x16xi1>, vector<16x16xf32>
    %cst_19 = arith.constant dense<0xFF800000> : vector<16xf32>
    %53 = vector.multi_reduction <maximumf>, %50, %cst_19 [1] : vector<16x16xf32> to vector<16xf32>
    %54 = vector.shape_cast %53 : vector<16xf32> to vector<16x1xf32>
    %cst_20 = arith.constant dense<0xFF800000> : vector<16xf32>
    %55 = vector.multi_reduction <maximumf>, %52, %cst_20 [1] : vector<16x16xf32> to vector<16xf32>
    %56 = vector.shape_cast %55 : vector<16xf32> to vector<16x1xf32>
    %57 = vector.broadcast %54 : vector<16x1xf32> to vector<16x16xf32>
    %58 = arith.subf %50, %57 : vector<16x16xf32>
    %59 = math.exp %58 : vector<16x16xf32>
    %cst_21 = arith.constant dense<0.000000e+00> : vector<16xf32>
    %60 = vector.multi_reduction <add>, %59, %cst_21 [1] : vector<16x16xf32> to vector<16xf32>
    %61 = vector.shape_cast %60 : vector<16xf32> to vector<16x1xf32>
    %62 = math.log %61 : vector<16x1xf32>
    %63 = arith.addf %62, %54 : vector<16x1xf32>
    %64 = vector.broadcast %56 : vector<16x1xf32> to vector<16x16xf32>
    %65 = arith.subf %52, %64 : vector<16x16xf32>
    %66 = math.exp %65 : vector<16x16xf32>
    %cst_22 = arith.constant dense<0.000000e+00> : vector<16xf32>
    %67 = vector.multi_reduction <add>, %66, %cst_22 [1] : vector<16x16xf32> to vector<16xf32>
    %68 = vector.shape_cast %67 : vector<16xf32> to vector<16x1xf32>
    %69 = math.log %68 : vector<16x1xf32>
    %70 = arith.addf %69, %56 : vector<16x1xf32>
    %71 = arith.addf %63, %70 : vector<16x1xf32>
    %cst_23 = arith.constant 0.000000e+00 : f32
    %72 = vector.broadcast %cst_23 : f32 to vector<16x1xf32>
    %73 = arith.maximumf %71, %72 : vector<16x1xf32>
    %74 = math.absf %71 : vector<16x1xf32>
    %cst_24 = arith.constant 0.000000e+00 : f32
    %75 = vector.broadcast %cst_24 : f32 to vector<16x1xf32>
    %76 = arith.subf %75, %74 : vector<16x1xf32>
    %77 = math.exp %76 : vector<16x1xf32>
    %cst_25 = arith.constant 1.000000e+00 : f32
    %78 = vector.broadcast %cst_25 : f32 to vector<16x1xf32>
    %79 = arith.addf %78, %77 : vector<16x1xf32>
    %80 = math.log %79 : vector<16x1xf32>
    %81 = arith.addf %73, %80 : vector<16x1xf32>
    %82 = tpu.iota {dimensions = array<i32: 0>} : vector<16x1xi32>
    %c16_i32_26 = arith.constant 16 : i32
    %83 = arith.muli %arg0, %c16_i32_26 : i32
    %84 = vector.broadcast %83 : i32 to vector<16x1xi32>
    %85 = arith.addi %82, %84 : vector<16x1xi32>
    %c12_i32_27 = arith.constant 12 : i32
    %86 = vector.broadcast %c12_i32_27 : i32 to vector<16x1xi32>
    %87 = arith.cmpi slt, %85, %86 : vector<16x1xi32>
    %cst_28 = arith.constant 0.000000e+00 : f32
    %88 = vector.broadcast %cst_28 : f32 to vector<16x1xf32>
    %89 = arith.select %87, %81, %88 : vector<16x1xi1>, vector<16x1xf32>
    %c0_29 = arith.constant 0 : index
    %c0_30 = arith.constant 0 : index
    %90 = vector.load %arg7[%c0_29, %c0_30] : memref<16x1xf32, #tpu.memory_space<vmem>>, vector<16x1xf32>
    %91 = arith.addf %90, %89 : vector<16x1xf32>
    %c0_31 = arith.constant 0 : index
    %c0_32 = arith.constant 0 : index
    %92 = vector.load %arg7[%c0_31, %c0_32] : memref<16x1xf32, #tpu.memory_space<vmem>>, vector<16x1xf32>
    tpu.vector_store %arg7[%c0_31, %c0_32], %91 {strides = array<i32>} : memref<16x1xf32, #tpu.memory_space<vmem>>, vector<16x1xf32>,
    %c0_i32_33 = arith.constant 0 : i32
    %93 = arith.cmpi eq, %arg0, %c0_i32_33 : i32
    %94 = arith.extui %93 : i1 to i32
    %c0_i32_34 = arith.constant 0 : i32
    %95 = arith.cmpi ne, %94, %c0_i32_34 : i32
    scf.if %95 {
      %c0_35 = arith.constant 0 : index
      %c0_36 = arith.constant 0 : index
      %96 = vector.load %arg7[%c0_35, %c0_36] : memref<16x1xf32, #tpu.memory_space<vmem>>, vector<16x1xf32>
      %97 = vector.shape_cast %96 : vector<16x1xf32> to vector<1x16x1xf32>
      %cst_37 = arith.constant dense<0.000000e+00> : vector<1xf32>
      %98 = vector.multi_reduction <add>, %97, %cst_37 [1, 2] : vector<1x16x1xf32> to vector<1xf32>
      %99 = vector.shape_cast %98 : vector<1xf32> to vector<1x1x1xf32>
      %100 = vector.extract %99[0, 0, 0] : f32 from vector<1x1x1xf32>
      %cst_38 = arith.constant 0.0833333358 : f32
      %101 = arith.mulf %100, %cst_38 : f32
      %102 = vector.broadcast %101 : f32 to vector<1x1xf32>
      %c0_39 = arith.constant 0 : index
      %c0_40 = arith.constant 0 : index
      %103 = vector.load %arg6[%c0_39, %c0_40] : memref<1x1xf32, #tpu.memory_space<vmem>>, vector<1x1xf32>
      tpu.vector_store %arg6[%c0_39, %c0_40], %102 {strides = array<i32>} : memref<1x1xf32, #tpu.memory_space<vmem>>, vector<1x1xf32>,
    } else {
    }
    return
  }
  func.func @transform_0(%arg0: i32) -> i32 {
    %c0_i32 = arith.constant 0 : i32
    %c0_i32_0 = arith.constant 0 : i32
    return %c0_i32 : i32
  }
  func.func @transform_1(%arg0: i32) -> (i32, i32) {
    %c0_i32 = arith.constant 0 : i32
    %c0_i32_0 = arith.constant 0 : i32
    return %arg0, %c0_i32 : i32, i32
  }
  func.func @transform_2(%arg0: i32) -> (i32, i32) {
    %c0_i32 = arith.constant 0 : i32
    %c0_i32_0 = arith.constant 0 : i32
    %c0_i32_1 = arith.constant 0 : i32
    return %c0_i32, %c0_i32_0 : i32, i32
  }
  func.func @transform_3(%arg0: i32) -> (i32, i32) {
    %c0_i32 = arith.constant 0 : i32
    %c0_i32_0 = arith.constant 0 : i32
    return %arg0, %c0_i32 : i32, i32
  }
  func.func @transform_4(%arg0: i32) -> (i32, i32) {
    %c0_i32 = arith.constant 0 : i32
    %c0_i32_0 = arith.constant 0 : i32
    %c0_i32_1 = arith.constant 0 : i32
    return %c0_i32, %c0_i32_0 : i32, i32
  }
  func.func @transform_5(%arg0: i32) -> (i32, i32) {
    %c0_i32 = arith.constant 0 : i32
    %c0_i32_0 = arith.constant 0 : i32
    %c0_i32_1 = arith.constant 0 : i32
    return %c0_i32, %c0_i32_0 : i32, i32
  }
}

</mosaic_0001>

<bundles_post_ra>
// kernel: tpu_custom_call.1
= control target key start
LH: loop header
LB: loop body
LE: loop exit
PB: predicated region body
PF: predicated region fallthrough
CT: control target
= control target key end

     0   :  { %10 = vsyncpa [#allocation6], 0  ;;  %s486_s0 = inlined_call_operand.vmem [shape: f32[2], index: 0, kind: input, shape index: {}]   ;;  %s487_s1 = inlined_call_operand.vmem [shape: f32[16,32], index: 1, kind: input, shape index: {}]   ;;  %s488_s2 = inlined_call_operand.hbm [shape: f32[16,32], index: 2, kind: input, shape index: {}]   ;;  %s489_s3 = inlined_call_operand.vmem [shape: s32[16,1], index: 3, kind: input, shape index: {}]   ;;  %s490_s4 = inlined_call_operand.vmem [shape: s32[1,16], index: 4, kind: input, shape index: {}]   ;;  %s491_s5 = inlined_call_operand.hbm [shape: f32[1,1], index: 5, kind: output, shape index: {}]  }
   0x1   :  { %11 = vsyncpa [#allocation4], 0 }
   0x2   :  { %12 = vsyncpa [#allocation5], 0  ;;  %s18_s20 = sshll.u32 %s486_s0, 4  ;;  %s28_s23 = sshll.u32 %s488_s2, 4  ;;  %s19_s20 = int_to_ptr.vmem [resolvable:$true] %s18_s20  ;;  %s29_s23 = int_to_ptr.hbm [resolvable:$true] %s28_s23 }
   0x3   :  { %s393_s24 = smov [#allocation3]   ;;  %s394_s25 = smov [#allocation7]  }
   0x4   :  { %21 = dma.vmem_to_smem %s19_s20, 16, %s393_s24, [#allocation6]  }
   0x5   :  { %s30_s26 = sshll.u32 %s394_s25, 4  ;;  %s395_s27 = smov 128   ;;  %s31_s26 = int_to_ptr.vmem [resolvable:$true] %s30_s26 }
   0x6   :  { %s396_s28 = smov 8  }
   0x7   :  { %36 = dma.hbm_to_vmem [thread:$0]  %s29_s23, 256, %s31_s26, [#allocation4], %s395_s27, %s395_s27, %s396_s28  }
   0x8   :  { %387 = dma.done.wait [#allocation6], 16  }
   0x9   :  { %388 = vsyncadd [#allocation6], 4294967280 }
   0xa   :  { %389 = dma.done.wait [#allocation4], 256  }
   0xb   :  { %390 = vsyncadd [#allocation4], 4294967040 }
   0xc   :  { %49 = sfence }
   0xd   :  { %v62_v0 = vld [vmem:[#allocation7 + $0x8] sm:$0xff]  ;;  %vm63_vm0 = vcmask 261120   ;;  %v109_v1 = vld [vmem:[%s489_s3 + $0x8] sm:$0xff]  ;;  %v61_v2 = vld [vmem:[#allocation7] sm:$0xff]  ;;  %v397_v3 = vmov 0   ;;  %v99_v7 = vlaneseq  ;;  %s452_s12 = sld [smem:[#allocation3]] }
   0xe   :  { %285 = vmatpush.xpose.msk.msra.mxu0 %vm63_vm0, %v62_v0  ;;  %289 = vmatpush.xpose.msk.msra.mxu1 %vm63_vm0, %v62_v0  ;;  %v59_v4 = vld [vmem:[%s487_s1] sm:$0xff]  ;;  %v60_v5 = vld [vmem:[%s487_s1 + $0x8] sm:$0xff]  ;;  %s456_s1 = sld [smem:[#allocation3 + $0x1]]  ;;  %vm398_vm3 = vmmov 1   ;;  %vm165_vm13 = vcmask 130048   ;;  %vm56_vm14 = vcmask 7168  }
   0xf   :  { %301 = vset.pattern.permute.xlu0 %v397_v3  ;;  %v108_v6 = vld [vmem:[%s489_s3] sm:$0xff]  ;;  %v100_v8 = vshrl.u32 %v99_v7, 7  ;;  %v107_v11 = vand.u32 127, %v99_v7  ;;  %s400_s14 = smov [#allocation8]   ;;  %s273_s18 = sshll.u32 %s491_s5, 4  ;;  %s274_s18 = int_to_ptr.hbm [resolvable:$true] %s273_s18 }
  0x10   :  { %115 = vperm.xlu0 %301, %v109_v1   ;;  %v302_v10 = vld [vmem:[%s490_s4] ss:$0 sm:$0xff]  ;;  %s271_s15 = sshll.u32 %s400_s14, 4  ;;  %s272_s15 = int_to_ptr.vmem [resolvable:$true] %s271_s15 }
  0x11   :  { %v454_v12 = vadd.s32 8, %v100_v8  ;;  %vm120_vm6 = vcmp.gt.s32.totalorder %v107_v11, %v100_v8  ;;  %vm160_vm12 = vcmp.lt.s32.totalorder %v107_v11, 12 }
  0x12   :  { %286 = vmatpush.xpose.msk.msra.mxu0 %vm63_vm0, %v61_v2  ;;  %290 = vmatpush.xpose.msk.msra.mxu1 %vm63_vm0, %v61_v2 }
  0x13   :  { %vm121_vm2 = vcmp.gt.s32.totalorder %v107_v11, %v454_v12  ;;  %s132_s3 = sadd.f32 1.0, %s452_s12  ;;  %v138_v15 = vstv %s452_s12  ;;  %v399_v11 = vmov 0.0   ;;  %vm235_vm15 = vcmp.lt.s32.totalorder %v454_v12, 12 }
  0x14   :  { %s143_s4 = ssub.f32 1.0, %s452_s12  ;;  %v153_v30 = vstv %s456_s1  ;;  %57 = vst.msk [vmem:[#allocation2] sm:$0xff] %vm56_vm14, %v399_v11 }
  0x15   :  { %287 = vmatmul.msk.f32.vlgmr.msra.gmra.mxu0 %vm63_vm0, %v59_v4  ;;  %288 = vmatmul.msk.f32.vlgmr.msra.gmra.mxu1 %vm63_vm0, %v60_v5  ;;  %v133_v14 = vstv %s132_s3  ;;  %s144_s13 = ssub.f32 0.0, %s456_s1  ;;  %58 = vst.msk [vmem:[#allocation2 + $0x8] sm:$0xff] %vm56_vm14, %v399_v11  ;;  %vm264_vm0 = vcmask 0  }
  0x16   :  { %v148_v25 = vstv %s143_s4 }
  0x17   :  { %v145_v24 = vstv %s144_s13 }
  0x18   :  { %112 = vperm.xlu0 %301, %v108_v6  }
  0x82   :  { %v116_v9 = vpop.permute.xlu0 %115 }
  0x83   :  { %vm119_vm1 = vcmp.eq.s32.totalorder %v116_v9, %v302_v10 }
  0x84   :  { %vm125_vm4 = vmxor %vm119_vm1, %vm398_vm3 }
  0x85   :  { %vm123_vm7 = vmand %vm119_vm1, %vm121_vm2 }
  0x86   :  { %vm127_vm9 = vmand %vm125_vm4, %vm121_vm2 }
  0x8a   :  { %v113_v13 = vpop.permute.xlu0 %112 }
  0x8b   :  { %vm118_vm5 = vcmp.eq.s32.totalorder %v113_v13, %v302_v10 }
  0x8c   :  { %vm124_vm8 = vmxor %vm118_vm5, %vm398_vm3 }
  0x8d   :  { %vm122_vm10 = vmand %vm118_vm5, %vm120_vm6 }
  0x8e   :  { %vm126_vm11 = vmand %vm124_vm8, %vm120_vm6 }
  0x92   :  { %v93_v16 = vpop.f32.mrf.mxu0  ;;  %v96_v17 = vpop.f32.mrf.mxu1 }
  0x93   :  { %v128_v18 = vsel %vm122_vm10, %v93_v16, 0.0  ;;  %v130_v19 = vsel %vm126_vm11, %v93_v16, 0.0  ;;  %v129_v20 = vsel %vm123_vm7, %v96_v17, 0.0  ;;  %v131_v21 = vsel %vm127_vm9, %v96_v17, 0.0 }
  0x94   :  { %v134_v22 = vsub.f32 %v133_v14, %v128_v18  ;;  %v139_v23 = vadd.f32 %v138_v15, %v130_v19  ;;  %v135_v26 = vsub.f32 %v133_v14, %v129_v20  ;;  %v140_v27 = vadd.f32 %v138_v15, %v131_v21 }
  0x95   :  { %v149_v34 = vsub.f32 %v128_v18, %v148_v25  ;;  %v150_v36 = vsub.f32 %v129_v20, %v148_v25  ;;  %v156_v41 = vsub.f32 %v130_v19, %v138_v15  ;;  %v157_v43 = vsub.f32 %v131_v21, %v138_v15 }
  0x96   :  { %v136_v28 = vmax.f32 %v134_v22, 0.0  ;;  %v141_v29 = vmax.f32 %v139_v23, 0.0  ;;  %v137_v31 = vmax.f32 %v135_v26, 0.0  ;;  %v142_v32 = vmax.f32 %v140_v27, 0.0 }
  0x98   :  { %v146_v33 = vmul.f32 %v145_v24, %v136_v28  ;;  %v147_v35 = vmul.f32 %v145_v24, %v137_v31  ;;  %v154_v37 = vmul.f32 %v153_v30, %v141_v29  ;;  %v155_v39 = vmul.f32 %v153_v30, %v142_v32 }
  0x9a   :  { %v151_v38 = vmul.f32 %v149_v34, %v146_v33  ;;  %v152_v40 = vmul.f32 %v150_v36, %v147_v35  ;;  %v158_v47 = vmul.f32 %v156_v41, %v154_v37  ;;  %v159_v48 = vmul.f32 %v157_v43, %v155_v39  ;;  %v239_v43 = vld [vmem:[#allocation2 + $0x8] sm:$0xff] }
  0x9c   :  { %v161_v42 = vsel %vm160_vm12, %v151_v38, -1e+30  ;;  %v162_v44 = vsel %vm160_vm12, %v152_v40, -1e+30  ;;  %v163_v49 = vsel %vm160_vm12, %v158_v47, -1e+30 }
  0x9d   :  { %v166_v45 = vsel %vm165_vm13, %v161_v42, -inf  ;;  %v169_v46 = vsel %vm165_vm13, %v162_v44, -inf  ;;  %v164_v50 = vsel %vm160_vm12, %v159_v48, -1e+30  ;;  %v172_v51 = vsel %vm165_vm13, %v163_v49, -inf }
  0x9e   :  { %167 = vmax.xlane.f32.xlu2 %v166_v45  ;;  %170 = vmax.xlane.f32.xlu1 %v169_v46  ;;  %v175_v52 = vsel %vm165_vm13, %v164_v50, -inf }
  0xa6   :  { %173 = vmax.xlane.f32.xlu2 %v172_v51  ;;  %176 = vmax.xlane.f32.xlu1 %v175_v52 }
 0x111   :  { %v168_v53 = vpop.xlane.xlu2 %167  ;;  %v171_v54 = vpop.xlane.xlu1 %170 }
 0x112   :  { %v178_v55 = vsub.f32 %v161_v42, %v168_v53  ;;  %v179_v56 = vsub.f32 %v162_v44, %v171_v54 }
 0x114   :  { %v180_v57 = vmul.f32 1.442695, %v178_v55  ;;  %v182_v58 = vmul.f32 1.442695, %v179_v56 }
 0x116   :  { %303 = vpow2.f32 %v180_v57 }
 0x117   :  { %305 = vpow2.f32 %v182_v58 }
 0x119   :  { %v177_v59 = vpop.xlane.xlu1 %176  ;;  %v174_v60 = vpop.xlane.xlu2 %173 }
 0x11a   :  { %v197_v61 = vsub.f32 %v164_v50, %v177_v59  ;;  %v196_v1 = vsub.f32 %v163_v49, %v174_v60  ;;  %v238_v49 = vld [vmem:[#allocation2] sm:$0xff] }
 0x11c   :  { %v304_v62 = vpop.eup %303  ;;  %v200_v0 = vmul.f32 1.442695, %v197_v61  ;;  %v198_v4 = vmul.f32 1.442695, %v196_v1 }
 0x11d   :  { %v306_v63 = vpop.eup %305  ;;  %v184_v2 = vsel %vm165_vm13, %v304_v62, 0.0 }
 0x11e   :  { %v187_v3 = vsel %vm165_vm13, %v306_v63, 0.0  ;;  %185 = vadd.xlane.f32.xlu2 %v184_v2  ;;  %307 = vpow2.f32 %v200_v0 }
 0x11f   :  { %188 = vadd.xlane.f32.xlu0 %v187_v3  ;;  %309 = vpow2.f32 %v198_v4 }
 0x124   :  { %v308_v5 = vpop.eup %307 }
 0x125   :  { %v205_v6 = vsel %vm165_vm13, %v308_v5, 0.0  ;;  %v310_v7 = vpop.eup %309 }
 0x126   :  { %206 = vadd.xlane.f32.xlu1 %v205_v6  ;;  %v202_v8 = vsel %vm165_vm13, %v310_v7, 0.0 }
 0x12e   :  { %203 = vadd.xlane.f32.xlu1 %v202_v8 }
 0x191   :  { %v186_v13 = vpop.xlane.xlu2 %185 }
 0x192   :  { %v189_v9 = vpop.xlane.xlu0 %188 }
 0x193   :  { %311 = vlog2.f32 %v189_v9 }
 0x199   :  { %v207_v10 = vpop.xlane.xlu1 %206  ;;  %v312_v14 = vpop.eup %311 }
 0x19a   :  { %313 = vlog2.f32 %v207_v10  ;;  %v193_v15 = vmul.f32 0.6931472, %v312_v14 }
 0x19b   :  { %315 = vlog2.f32 %v186_v13 }
 0x19c   :  { %v195_v19 = vadd.f32 %v193_v15, %v171_v54 }
 0x1a0   :  { %v314_v16 = vpop.eup %313 }
 0x1a1   :  { %v211_v17 = vmul.f32 0.6931472, %v314_v16  ;;  %v204_v18 = vpop.xlane.xlu1 %203  ;;  %v316_v21 = vpop.eup %315 }
 0x1a2   :  { %317 = vlog2.f32 %v204_v18  ;;  %v191_v23 = vmul.f32 0.6931472, %v316_v21 }
 0x1a3   :  { %v213_v20 = vadd.f32 %v211_v17, %v177_v59 }
 0x1a4   :  { %v194_v28 = vadd.f32 %v191_v23, %v168_v53 }
 0x1a5   :  { %v215_v22 = vadd.f32 %v213_v20, %v195_v19 }
 0x1a7   :  { %v219_v24 = vand.u32 2147483647, %v215_v22  ;;  %v217_v40 = vmax.f32 %v215_v22, 0.0 }
 0x1a8   :  { %v318_v25 = vpop.eup %317 }
 0x1a9   :  { %v221_v26 = vsub.f32 0.0, %v219_v24  ;;  %v209_v27 = vmul.f32 0.6931472, %v318_v25 }
 0x1ab   :  { %v224_v29 = vmul.f32 1.442695, %v221_v26  ;;  %v212_v30 = vadd.f32 %v209_v27, %v174_v60 }
 0x1ad   :  { %319 = vpow2.f32 %v224_v29  ;;  %v214_v31 = vadd.f32 %v212_v30, %v194_v28 }
 0x1af   :  { %v218_v32 = vand.u32 2147483647, %v214_v31  ;;  %v216_v47 = vmax.f32 %v214_v31, 0.0 }
 0x1b1   :  { %v220_v33 = vsub.f32 0.0, %v218_v32 }
 0x1b3   :  { %v320_v34 = vpop.eup %319  ;;  %v222_v35 = vmul.f32 1.442695, %v220_v33 }
 0x1b4   :  { %v227_v36 = vadd.f32 1.0, %v320_v34 }
 0x1b5   :  { %321 = vpow2.f32 %v222_v35 }
 0x1b6   :  { %323 = vlog2.f32 %v227_v36 }
 0x1bb   :  { %v322_v37 = vpop.eup %321 }
 0x1bc   :  { %v324_v38 = vpop.eup %323  ;;  %v226_v39 = vadd.f32 1.0, %v322_v37 }
 0x1bd   :  { %v231_v41 = vmul.f32 0.6931472, %v324_v38 }
 0x1be   :  { %325 = vlog2.f32 %v226_v39 }
 0x1bf   :  { %v233_v42 = vadd.f32 %v231_v41, %v217_v40 }
 0x1c1   :  { %v237_v44 = vsel %vm235_vm15, %v233_v42, 0.0 }
 0x1c2   :  { %v241_v45 = vadd.f32 %v239_v43, %v237_v44 }
 0x1c4   :  { %v326_v46 = vpop.eup %325  ;;  %244 = vst.msk [vmem:[#allocation2 + $0x8] sm:$0xff] %vm56_vm14, %v241_v45 }
 0x1c5   :  { %v229_v48 = vmul.f32 0.6931472, %v326_v46 }
 0x1c7   :  { %v232_v50 = vadd.f32 %v229_v48, %v216_v47 }
 0x1c9   :  { %v240_v51 = vadd.f32 %v238_v49, %v232_v50 }
 0x1cb   :  { %243 = vst.msk [vmem:[#allocation2] sm:$0xff] %vm56_vm14, %v240_v51  ;;  %v249_v52 = vld [vmem:[#allocation2 + $0x8] sm:$0xff] }
 0x1cc   :  { %v251_v12 = vsel %vm56_vm14, %v249_v52, 0.0 }
 0x1d2   :  { %v248_v53 = vld [vmem:[#allocation2] sm:$0xff] }
 0x1d3   :  { %v250_v54 = vsel %vm56_vm14, %v248_v53, 0.0 }
 0x1d4   :  { %v252_v55 = vadd.f32 %v251_v12, %v250_v54 }
 0x1d6   :  { %253 = vadd.xlane.f32.xlu2 %v252_v55 }
 0x249   :  { %v254_v56 = vpop.xlane.xlu2 %253 }
 0x24a   :  { %v255_v57 = vrot.slane %v254_v56, 4 }
 0x24c   :  { %v256_v58 = vadd.f32 %v255_v57, %v254_v56 }
 0x24e   :  { %v257_v59 = vrot.slane %v256_v58, 2 }
 0x250   :  { %v258_v60 = vadd.f32 %v257_v59, %v256_v58 }
 0x252   :  { %v259_v61 = vrot.slane %v258_v60, 1 }
 0x254   :  { %v260_v62 = vadd.f32 %v259_v61, %v258_v60 }
 0x256   :  { %291 = vpush %v260_v62 }
 0x287   :  { %s292_s19 = spop %291 }
 0x288   :  { %s262_s20 = smul.f32 0.083333336, %s292_s19 }
 0x28a   :  { %v263_v63 = vstv %s262_s20 }
 0x28b   :  { %265 = vst.msk [vmem:[#allocation8] sm:$0x1] %vm264_vm0, %v263_v63 }
 0x28c   :  { %276 = dma.vmem_to_hbm [thread:$0]  %s272_s15, 16, %s274_s18, [#allocation5]  }
 0x28d   :  { %391 = dma.done.wait [#allocation5], 16  }
 0x28e   :  { %392 = vsyncadd [#allocation5], 4294967280 }
 0x28f   :  { %281 = vsyncpa [#allocation4], 1 }
 0x290   :  { %282 = vsyncpa [#allocation5], 1 }
 0x291   :  { %283 = vsyncpa [#allocation6], 1 }

</bundles_post_ra>
